<compile_context>
chip_gen: v6e
topology: v6e:2x2x1
jax: 0.10.0
libtpu: 0.0.40
codegen_flags: <defaults>
</compile_context>

<pallas_src>
import functools
import math

import jax
import jax.numpy as jnp
from jax.experimental import pallas as pl
from jax.experimental.pallas import tpu as pltpu

LANE = 128
SUBLANE = 8


def _ceil_div(a, b):
    return -(-a // b)


def _tpu_defaults():
    """Best-effort generation probe: (tensorcores per device, f32 row cap)."""
    n_cores, base_cap = 1, 4096
    kind = ""
    try:
        kind = jax.devices()[0].device_kind or ""
    except Exception:
        pass
    try:
        info = pltpu.get_tpu_info()
    except Exception:
        info = None
    if info is not None:
        for name in ("num_cores", "core_count", "num_tensorcores",
                     "tensorcore_count", "num_cores_per_chip"):
            v = getattr(info, name, None)
            if isinstance(v, int) and v > 1:
                n_cores = int(v)
                break
        if not kind:
            kind = str(getattr(info, "chip_version", ""))
    # v7x-class parts (~3.2 TB/s HBM per TC): amortise the ~0.35us/step grid
    # overhead with 4 MiB-per-input blocks.
    if "7" in kind:
        base_cap = 8192
    return n_cores, base_cap


def _rel_err_sum_kernel(yp_ref, yt_ref, out_ref, acc_ref, *,
                        eps, rows_total, block_rows, blocks_per_split,
                        needs_mask, approx_recip):
    s = pl.program_id(0)   # split axis (one per TensorCore when core-parallel)
    j = pl.program_id(1)   # sequential reduction axis (last)

    # Zero the single-vreg accumulator at the start of each split.
    @pl.when(j == 0)
    def _():
        acc_ref[...] = jnp.zeros_like(acc_ref)

    # Cast in-kernel (VPU) so HBM traffic stays in the native dtype.
    yp = yp_ref[...].astype(jnp.float32)
    yt = yt_ref[...].astype(jnp.float32)

    denom = jnp.maximum(yt, jnp.float32(eps))          # torch.clamp(min=eps)
    # Reciprocal on the EUP slot; approx=False keeps exact-division parity.
    rel = jnp.abs((yp - yt) * pl.reciprocal(denom, approx=approx_recip))

    def _fold(x):
        # (block_rows, 128) -> (block_rows//8, 8, 128) -> pairwise vreg adds.
        return jnp.sum(x.reshape(block_rows // SUBLANE, SUBLANE, LANE), axis=0)

    if needs_mask:
        # Only the boundary / clamped-duplicate block pays for the mask; all
        # steady-state steps take the unmasked branch (no iota/compare/where).
        block_start = (s * blocks_per_split + j) * block_rows
        is_full = block_start + block_rows <= rows_total

        @pl.when(is_full)
        def _():
            acc_ref[...] += _fold(rel)

        @pl.when(jnp.logical_not(is_full))
        def _():
            row = jax.lax.broadcasted_iota(jnp.int32, rel.shape, 0)
            valid = (block_start + row) < rows_total
            # NOTE: select (not arithmetic) masking — padded/garbage rows may
            # be NaN/Inf after the reciprocal and must be dropped, not scaled.
            acc_ref[...] += _fold(jnp.where(valid, rel, jnp.float32(0.0)))
    else:
        acc_ref[...] += _fold(rel)

    # Single cross-sublane reduce per split; lane-dense (1, 128) store.
    @pl.when(j == pl.num_programs(1) - 1)
    def _():
        out_ref[...] = jnp.sum(acc_ref[...], axis=0, keepdims=True)


def relative_error_loss(y_pred, y_true, eps=1e-8, *, max_block_rows=None,
                        core_splits=None, approx_recip=False):
    """Pallas TPU implementation of RelativeErrorLoss.forward."""
    assert y_pred.shape == y_true.shape
    total = int(math.prod(y_pred.shape))
    if total == 0:
        return jnp.float32(jnp.nan)  # torch: mean of empty tensor is nan

    yp_flat = jnp.ravel(y_pred)
    yt_flat = jnp.ravel(y_true)

    rows_total = total // LANE
    tail = total - rows_total * LANE

    loss_sum = jnp.float32(0.0)

    if rows_total > 0:
        itemsize = jnp.dtype(y_pred.dtype).itemsize
        sub = {4: 8, 2: 16, 1: 32}.get(itemsize, SUBLANE)

        n_cores, base_cap = _tpu_defaults()
        if max_block_rows is None:
            # Same bytes per block regardless of dtype width.
            max_block_rows = base_cap * max(1, 4 // itemsize)
        if core_splits is None:
            core_splits = n_cores

        block_rows = min(int(max_block_rows), _ceil_div(rows_total, sub) * sub)
        block_rows = max(sub, (block_rows // sub) * sub)

        blocks_total = _ceil_div(rows_total, block_rows)
        n_splits = max(1, min(int(core_splits), blocks_total))

        bulk = rows_total * LANE
        # Free reshape for contiguous lane-aligned arrays; no padding copy.
        yp2 = yp_flat[:bulk].reshape(rows_total, LANE)
        yt2 = yt_flat[:bulk].reshape(rows_total, LANE)

        # Explicit scoped-VMEM budget: 2 inputs x 2 pipeline buffers + tiny
        # accumulator/output, with 2x headroom (covers v5e's 16 MiB default).
        block_bytes = block_rows * LANE * itemsize
        req = 2 * 2 * block_bytes + SUBLANE * LANE * 4 + n_splits * LANE * 4
        vmem_limit = int(min(max(2 * req, 16 << 20), 40 << 20))

        def _run(ns, use_core_parallel):
            bps = _ceil_div(blocks_total, ns)
            needs_mask = (rows_total % block_rows != 0) or (ns * bps != blocks_total)

            def in_map(s, j):
                # Clamp so an over-covering block index never issues an OOB
                # DMA; the in-kernel row mask zeroes that block's contribution.
                return (jnp.minimum(s * bps + j, blocks_total - 1), 0)

            kernel = functools.partial(
                _rel_err_sum_kernel,
                eps=float(eps),
                rows_total=rows_total,
                block_rows=block_rows,
                blocks_per_split=bps,
                needs_mask=needs_mask,
                approx_recip=bool(approx_recip),
            )
            dims = ((pltpu.CORE_PARALLEL if use_core_parallel else pltpu.ARBITRARY),
                    pltpu.ARBITRARY)
            return pl.pallas_call(
                kernel,
                out_shape=jax.ShapeDtypeStruct((ns, LANE), jnp.float32),
                grid_spec=pltpu.PrefetchScalarGridSpec(
                    num_scalar_prefetch=0,
                    grid=(ns, bps),
                    in_specs=[
                        pl.BlockSpec((block_rows, LANE), in_map),
                        pl.BlockSpec((block_rows, LANE), in_map),
                    ],
                    out_specs=pl.BlockSpec((1, LANE), lambda s, j: (s, 0)),
                    scratch_shapes=[pltpu.VMEM((SUBLANE, LANE), jnp.float32)],
                ),
                compiler_params=pltpu.CompilerParams(
                    dimension_semantics=dims,
                    vmem_limit_bytes=vmem_limit),
            )(yp2, yt2)

        if n_splits > 1:
            # Core-parallel split across TensorCores on multi-core parts; fall
            # back to a single sequential split if this toolchain/part rejects
            # CORE_PARALLEL (correctness is identical either way).
            try:
                partials = _run(n_splits, True)
            except Exception:
                partials = _run(1, False)
        else:
            partials = _run(1, False)

        loss_sum = loss_sum + jnp.sum(partials)

    if tail:
        # <128 leftover elements: tiny, do it in plain jnp (no padding copy).
        tp = yp_flat[rows_total * LANE:].astype(jnp.float32)
        tt = yt_flat[rows_total * LANE:].astype(jnp.float32)
        loss_sum = loss_sum + jnp.sum(
            jnp.abs((tp - tt) / jnp.maximum(tt, jnp.float32(eps))))

    return loss_sum / jnp.float32(total)


def _reference(y_pred, y_true, eps=1e-8):
    return jnp.mean(jnp.abs((y_pred - y_true) / jnp.maximum(y_true, eps)))


if __name__ == "__main__":
    key = jax.random.PRNGKey(0)
    k1, k2, k3, k4, k5, k6 = jax.random.split(key, 6)

    # Primary small shape (NCHW-like image-regression tensor): exact tiling,
    # mask-free kernel variant.
    shape = (2, 4, 16, 16)
    y_pred = jax.random.normal(k1, shape, dtype=jnp.float32)
    y_true = jax.random.normal(k2, shape, dtype=jnp.float32) * 0.5
    loss = jax.block_until_ready(relative_error_loss(y_pred, y_true, eps=1e-8))
    ref = _reference(y_pred, y_true, eps=1e-8)
    assert jnp.allclose(loss, ref, rtol=1e-5, atol=1e-6), (loss, ref)

    # Awkward shape + small block cap: multi-block accumulation, partial last
    # block (masked branch), and the <128-element flat-tail path.
    shape2 = (4, 3, 50, 37)
    yp_b = jax.random.normal(k3, shape2, dtype=jnp.float32)
    yt_b = jax.random.normal(k4, shape2, dtype=jnp.float32) * 0.5
    loss2 = jax.block_until_ready(
        relative_error_loss(yp_b, yt_b, eps=1e-8, max_block_rows=64))
    ref2 = _reference(yp_b, yt_b, eps=1e-8)
    assert jnp.allclose(loss2, ref2, rtol=1e-5, atol=1e-6), (loss2, ref2)

    # Sub-lane-sized input: pure jnp tail path (no Pallas call).
    shape3 = (8, 9)
    yp_c = jax.random.normal(k5, shape3, dtype=jnp.float32)
    yt_c = jax.random.normal(k6, shape3, dtype=jnp.float32) * 0.5
    loss3 = jax.block_until_ready(relative_error_loss(yp_c, yt_c, eps=1e-8))
    ref3 = _reference(yp_c, yt_c, eps=1e-8)
    assert jnp.allclose(loss3, ref3, rtol=1e-5, atol=1e-6), (loss3, ref3)

    print("KERNEL_OK")
</pallas_src>

<mosaic_0001>
module attributes {stable_mosaic.version = 11 : i64} {
  func.func @_rel_err_sum_kernel(%arg0: i32, %arg1: i32, %arg2: memref<16x128xf32, #tpu.memory_space<vmem>>, %arg3: memref<16x128xf32, #tpu.memory_space<vmem>>, %arg4: memref<1x128xf32, #tpu.memory_space<vmem>>, %arg5: memref<8x128xf32, #tpu.memory_space<vmem>>) attributes {dimension_semantics = [#tpu.dimension_semantics<arbitrary>, #tpu.dimension_semantics<arbitrary>], iteration_bounds = array<i64: 1, 1>, scalar_prefetch = 0 : i64, scratch_operands = 1 : i64, tpu.core_type = #tpu.core_type<tc>, window_params = [{transform_indices = @transform_0, window_bounds = array<i64: 16, 128>}, {transform_indices = @transform_1, window_bounds = array<i64: 16, 128>}, {transform_indices = @transform_2, window_bounds = array<i64: 1, 128>}]} {
    %c0_i32 = arith.constant 0 : i32
    %0 = arith.cmpi eq, %arg1, %c0_i32 : i32
    %1 = arith.extui %0 : i1 to i32
    %c0_i32_0 = arith.constant 0 : i32
    %2 = arith.cmpi ne, %1, %c0_i32_0 : i32
    scf.if %2 {
      %cst_11 = arith.constant 0.000000e+00 : f32
      %19 = vector.broadcast %cst_11 : f32 to vector<8x128xf32>
      %c0_12 = arith.constant 0 : index
      %c0_13 = arith.constant 0 : index
      %20 = vector.load %arg5[%c0_12, %c0_13] : memref<8x128xf32, #tpu.memory_space<vmem>>, vector<8x128xf32>
      tpu.vector_store %arg5[%c0_12, %c0_13], %19 {strides = array<i32>} : memref<8x128xf32, #tpu.memory_space<vmem>>, vector<8x128xf32>,
    } else {
    }
    %c0 = arith.constant 0 : index
    %c0_1 = arith.constant 0 : index
    %3 = vector.load %arg2[%c0, %c0_1] : memref<16x128xf32, #tpu.memory_space<vmem>>, vector<16x128xf32>
    %c0_2 = arith.constant 0 : index
    %c0_3 = arith.constant 0 : index
    %4 = vector.load %arg3[%c0_2, %c0_3] : memref<16x128xf32, #tpu.memory_space<vmem>>, vector<16x128xf32>
    %cst = arith.constant 9.99999993E-9 : f32
    %5 = vector.broadcast %cst : f32 to vector<16x128xf32>
    %6 = arith.maximumf %4, %5 : vector<16x128xf32>
    %7 = arith.subf %3, %4 : vector<16x128xf32>
    %8 = tpu.reciprocal %6 : vector<16x128xf32> -> vector<16x128xf32>
    %9 = arith.mulf %7, %8 : vector<16x128xf32>
    %10 = math.absf %9 : vector<16x128xf32>
    %c0_4 = arith.constant 0 : index
    %c0_5 = arith.constant 0 : index
    %11 = vector.load %arg5[%c0_4, %c0_5] : memref<8x128xf32, #tpu.memory_space<vmem>>, vector<8x128xf32>
    %12 = vector.shape_cast %10 : vector<16x128xf32> to vector<2x8x128xf32>
    %cst_6 = arith.constant dense<0.000000e+00> : vector<8x128xf32>
    %13 = vector.multi_reduction <add>, %12, %cst_6 [0] : vector<2x8x128xf32> to vector<8x128xf32>
    %14 = arith.addf %11, %13 : vector<8x128xf32>
    %c0_7 = arith.constant 0 : index
    %c0_8 = arith.constant 0 : index
    %15 = vector.load %arg5[%c0_7, %c0_8] : memref<8x128xf32, #tpu.memory_space<vmem>>, vector<8x128xf32>
    tpu.vector_store %arg5[%c0_7, %c0_8], %14 {strides = array<i32>} : memref<8x128xf32, #tpu.memory_space<vmem>>, vector<8x128xf32>,
    %c0_i32_9 = arith.constant 0 : i32
    %16 = arith.cmpi eq, %arg1, %c0_i32_9 : i32
    %17 = arith.extui %16 : i1 to i32
    %c0_i32_10 = arith.constant 0 : i32
    %18 = arith.cmpi ne, %17, %c0_i32_10 : i32
    scf.if %18 {
      %c0_11 = arith.constant 0 : index
      %c0_12 = arith.constant 0 : index
      %19 = vector.load %arg5[%c0_11, %c0_12] : memref<8x128xf32, #tpu.memory_space<vmem>>, vector<8x128xf32>
      %cst_13 = arith.constant dense<0.000000e+00> : vector<128xf32>
      %20 = vector.multi_reduction <add>, %19, %cst_13 [0] : vector<8x128xf32> to vector<128xf32>
      %21 = vector.shape_cast %20 : vector<128xf32> to vector<1x128xf32>
      %c0_14 = arith.constant 0 : index
      %c0_15 = arith.constant 0 : index
      %22 = vector.load %arg4[%c0_14, %c0_15] : memref<1x128xf32, #tpu.memory_space<vmem>>, vector<1x128xf32>
      tpu.vector_store %arg4[%c0_14, %c0_15], %21 {strides = array<i32>} : memref<1x128xf32, #tpu.memory_space<vmem>>, vector<1x128xf32>,
    } else {
    }
    return
  }
  func.func @transform_0(%arg0: i32, %arg1: i32) -> (i32, i32) {
    %c1_i32 = arith.constant 1 : i32
    %0 = arith.muli %arg0, %c1_i32 : i32
    %1 = arith.addi %0, %arg1 : i32
    %c0_i32 = arith.constant 0 : i32
    %2 = arith.minsi %1, %c0_i32 : i32
    %c0_i32_0 = arith.constant 0 : i32
    %c0_i32_1 = arith.constant 0 : i32
    return %2, %c0_i32_0 : i32, i32
  }
  func.func @transform_1(%arg0: i32, %arg1: i32) -> (i32, i32) {
    %c1_i32 = arith.constant 1 : i32
    %0 = arith.muli %arg0, %c1_i32 : i32
    %1 = arith.addi %0, %arg1 : i32
    %c0_i32 = arith.constant 0 : i32
    %2 = arith.minsi %1, %c0_i32 : i32
    %c0_i32_0 = arith.constant 0 : i32
    %c0_i32_1 = arith.constant 0 : i32
    return %2, %c0_i32_0 : i32, i32
  }
  func.func @transform_2(%arg0: i32, %arg1: i32) -> (i32, i32) {
    %c0_i32 = arith.constant 0 : i32
    %c0_i32_0 = arith.constant 0 : i32
    return %arg0, %c0_i32 : i32, i32
  }
}

</mosaic_0001>

<bundles_post_ra>
// kernel: tpu_custom_call.1
= control target key start
LH: loop header
LB: loop body
LE: loop exit
PB: predicated region body
PF: predicated region fallthrough
CT: control target
= control target key end

     0   :  { %7 = vsyncpa [#allocation4], 0  ;;  %s218_s0 = inlined_call_operand.hbm [shape: f32[16,128], index: 0, kind: input, shape index: {}]   ;;  %s219_s1 = inlined_call_operand.hbm [shape: f32[16,128], index: 1, kind: input, shape index: {}]   ;;  %s220_s2 = inlined_call_operand.hbm [shape: f32[1,128], index: 2, kind: output, shape index: {}]  }
   0x1   :  { %8 = vsyncpa [#allocation7], 0 }
   0x2   :  { %9 = vsyncpa [#allocation5], 0  ;;  %s189_s9 = smov [#allocation3]  }
   0x3   :  { %s21_s10 = sshll.u32 %s189_s9, 4  ;;  %s22_s10 = int_to_ptr.vmem [resolvable:$true] %s21_s10 }
   0x4   :  { %s131_s11 = scalar_lea.vmem %s22_s10, 256  ;;  %p136_p1 = scmp.lt.s32.totalorder %s22_s10, %s22_s10 }
   0x5   :  { %p132_p0 = scmp.ne.s32.totalorder %s22_s10, %s131_s11  ;;  %p137_p2 = scmp.lt.s32.totalorder %s131_s11, %s131_s11 }
   0x7   :  { %p138_p3 = por %p137_p2, %p136_p1 }
   0x9   :  { %p139_p4 = pnand %p138_p3, %p132_p0 }
   0xb   :  { %142 = shalt.err (!%p139_p4)
}
   0xc   :  { %s190_s12 = smov 128   ;;  %s191_s13 = smov 8  }
   0xd   :  { %27 = dma.hbm_to_vmem [thread:$0]  %s218_s0, 256, %s22_s10, [#allocation4], %s190_s12, %s190_s12, %s191_s13  }
   0xe   :  { %s192_s16 = smov [#allocation6]  }
   0xf   :  { %s39_s17 = sshll.u32 %s192_s16, 4  ;;  %s40_s17 = int_to_ptr.vmem [resolvable:$true] %s39_s17 }
  0x10   :  { %s151_s18 = scalar_lea.vmem %s40_s17, 256  ;;  %p156_p6 = scmp.lt.s32.totalorder %s40_s17, %s40_s17 }
  0x11   :  { %p152_p5 = scmp.ne.s32.totalorder %s40_s17, %s151_s18  ;;  %p157_p7 = scmp.lt.s32.totalorder %s151_s18, %s151_s18 }
  0x13   :  { %p158_p8 = por %p157_p7, %p156_p6 }
  0x15   :  { %p159_p9 = pnand %p158_p8, %p152_p5 }
  0x17   :  { %162 = shalt.err (!%p159_p9)
}
  0x18   :  { %45 = dma.hbm_to_vmem [thread:$0]  %s219_s1, 256, %s40_s17, [#allocation7], %s190_s12, %s190_s12, %s191_s13  }
  0x19   :  { %183 = dma.done.wait [#allocation4], 256  }
  0x1a   :  { %184 = vsyncadd [#allocation4], 4294967040 }
  0x1b   :  { %185 = dma.done.wait [#allocation7], 256  }
  0x1c   :  { %186 = vsyncadd [#allocation7], 4294967040  ;;  %v67_v0 = vld [vmem:[#allocation6] sm:$0xff]  ;;  %v68_v1 = vld [vmem:[#allocation6 + $0x8] sm:$0xff]  ;;  %s193_s0 = smov [#allocation8]  }
  0x1d   :  { %v69_v2 = vmax.f32 %v67_v0, 1e-08  ;;  %v70_v3 = vmax.f32 %v68_v1, 1e-08  ;;  %v65_v4 = vld [vmem:[#allocation3] sm:$0xff]  ;;  %v66_v5 = vld [vmem:[#allocation3 + $0x8] sm:$0xff] }
  0x1e   :  { %v71_v6 = vsub.f32 %v65_v4, %v67_v0  ;;  %v72_v7 = vsub.f32 %v66_v5, %v68_v1  ;;  %s100_s1 = sshll.u32 %s193_s0, 4  ;;  %s101_s1 = int_to_ptr.vmem [resolvable:$true] %s100_s1 }
  0x1f   :  { %119 = vrcp.f32 %v69_v2  ;;  %s163_s21 = scalar_lea.vmem %s101_s1, 16  ;;  %s167_s22 = scalar_lea.vmem %s101_s1, 32 }
  0x20   :  { %121 = vrcp.f32 %v70_v3  ;;  %p164_p10 = scmp.ne.s32.totalorder %s101_s1, %s163_s21  ;;  %p168_p11 = scmp.lt.s32.totalorder %s101_s1, %s101_s1 }
  0x21   :  { %p169_p12 = scmp.lt.s32.totalorder %s167_s22, %s163_s21 }
  0x23   :  { %p170_p13 = por %p169_p12, %p168_p11 }
  0x25   :  { %p171_p0 = pnand %p170_p13, %p164_p10 }
  0x2c   :  { %v120_v8 = vpop.eup %119 }
  0x2d   :  { %v122_v9 = vpop.eup %121  ;;  %v75_v10 = vmul.f32 %v120_v8, %v71_v6 }
  0x2e   :  { %v76_v11 = vmul.f32 %v122_v9, %v72_v7 }
  0x2f   :  { %v77_v12 = vand.u32 2147483647, %v75_v10 }
  0x30   :  { %v78_v13 = vand.u32 2147483647, %v76_v11 }
  0x32   :  { %v80_v14 = vadd.f32 %v78_v13, %v77_v12 }
  0x34   :  { %v87_v15 = vrot.slane %v80_v14, 4 }
  0x36   :  { %v88_v16 = vadd.f32 %v87_v15, %v80_v14 }
  0x38   :  { %v89_v17 = vrot.slane %v88_v16, 2 }
  0x3a   :  { %v90_v18 = vadd.f32 %v89_v17, %v88_v16 }
  0x3c   :  { %v91_v19 = vrot.slane %v90_v18, 1 }
  0x3e   :  { %v92_v20 = vadd.f32 %v91_v19, %v90_v18 }
  0x40   :  { %93 = vst [vmem:[#allocation8] sm:$0x1] %v92_v20 }
  0x41   :  { %174 = shalt.err (!%p171_p0)
}
  0x42   :  { %103 = dma.vmem_to_hbm [thread:$0]  %s101_s1, 16, %s220_s2, [#allocation5]  }
  0x43   :  { %187 = dma.done.wait [#allocation5], 16  }
  0x44   :  { %188 = vsyncadd [#allocation5], 4294967280 }
  0x45   :  { %107 = vsyncpa [#allocation4], 1 }
  0x46   :  { %108 = vsyncpa [#allocation7], 1 }
  0x47   :  { %109 = vsyncpa [#allocation5], 1 }

</bundles_post_ra>
